<compile_context>
chip_gen: v5e
topology: v5e:2x2
jax: 0.10.0
libtpu: 0.0.40
codegen_flags: <defaults>
</compile_context>

<pallas_src>
import functools

import jax
import jax.numpy as jnp
from jax.experimental import pallas as pl
from jax.experimental.pallas import tpu as pltpu

_SUBLANE = 8  # sublane tiling for f32


def _round_up(n, m):
    return ((n + m - 1) // m) * m


def _cdiv(a, b):
    return -(-a // b)


def ae_kernel(x_ref, w1_ref, b1_ref, w2_ref, b2_ref, o_ref):
    # Encoder: Linear + ReLU. f32 accumulation on the MXU, bias/ReLU on the VPU.
    h = jnp.dot(x_ref[...], w1_ref[...], preferred_element_type=jnp.float32)
    h = jnp.maximum(h + b1_ref[...], 0.0)          # b1_ref is (1, dout) -> broadcasts
    # Decoder: Linear.  h is kept in f32 (no silent downcast of the hidden acts).
    y = jnp.dot(h, w2_ref[...], preferred_element_type=jnp.float32)
    o_ref[...] = (y + b2_ref[...]).astype(o_ref.dtype)


@functools.partial(jax.jit, static_argnames=("block_batch",))
def autoencoder_forward(x, w1, b1, w2, b2, *, block_batch=4096):
    """Forward pass of the AutoEncoder.

    x:  [B, inputdim]
    w1: [inputdim, outputdim]   (pre-transposed e1 weight)
    b1: [outputdim]
    w2: [outputdim, inputdim]   (pre-transposed output_layer weight)
    b2: [inputdim]
    """
    B, din = x.shape
    din_w, dout = w1.shape
    assert din_w == din

    # ---- batch tile ------------------------------------------------------------
    # Multiple of 8 sublanes; capped at ceil(B/2) so the parallel axis has >= 2
    # grid steps whenever B > 8 (lets v7x use both TensorCores on small batches).
    tb = min(block_batch, _round_up(_cdiv(B, 2), _SUBLANE))
    tb = max(tb, _SUBLANE)
    grid = (_cdiv(B, tb),)

    # Biases as (1, features) rows so they broadcast against the (tb, features) tiles.
    b1_2d = b1.reshape(1, dout)
    b2_2d = b2.reshape(1, din)

    out = pl.pallas_call(
        ae_kernel,
        out_shape=jax.ShapeDtypeStruct((B, din), x.dtype),
        grid_spec=pl.GridSpec(
            grid=grid,
            in_specs=[
                # x: streams tile-by-tile along the batch axis; feature block is the
                # full (un-padded) array dim, so no extra HBM traffic.
                pl.BlockSpec((tb, din), lambda i: (i, 0)),
                # Weights / biases: constant index_map -> resident in VMEM.
                pl.BlockSpec((din, dout), lambda i: (0, 0)),
                pl.BlockSpec((1, dout), lambda i: (0, 0)),
                pl.BlockSpec((dout, din), lambda i: (0, 0)),
                pl.BlockSpec((1, din), lambda i: (0, 0)),
            ],
            out_specs=pl.BlockSpec((tb, din), lambda i: (i, 0)),
        ),
        compiler_params=pltpu.CompilerParams(
            # Batch tiles are independent -> shard across TensorCores (v7x megacore).
            dimension_semantics=("parallel",),
        ),
    )(x, w1, b1_2d, w2, b2_2d)

    return out


def reference_forward(x, w1, b1, w2, b2):
    h = jnp.maximum(x @ w1 + b1, 0.0)
    return h @ w2 + b2


if __name__ == "__main__":
    # Small, forward-consistent shapes: args.inputdim = 64, args.outputdim = 32.
    batch, inputdim, outputdim = 8, 64, 32

    key = jax.random.PRNGKey(0)
    kx, k1, k2, k3, k4 = jax.random.split(key, 5)

    # Deterministic synthetic parameters (PyTorch Linear-style uniform init bounds).
    bound1 = 1.0 / jnp.sqrt(inputdim)
    bound2 = 1.0 / jnp.sqrt(outputdim)
    x = jax.random.normal(kx, (batch, inputdim), dtype=jnp.float32)
    w1 = jax.random.uniform(k1, (inputdim, outputdim), jnp.float32, -bound1, bound1)
    b1 = jax.random.uniform(k2, (outputdim,), jnp.float32, -bound1, bound1)
    w2 = jax.random.uniform(k3, (outputdim, inputdim), jnp.float32, -bound2, bound2)
    b2 = jax.random.uniform(k4, (inputdim,), jnp.float32, -bound2, bound2)

    # 1) Small-batch test (single tile, batch == tile).
    out = autoencoder_forward(x, w1, b1, w2, b2)
    jax.block_until_ready(out)
    ref = reference_forward(x, w1, b1, w2, b2)
    assert out.shape == (batch, inputdim)
    assert jnp.allclose(out, ref, atol=1e-5, rtol=1e-5)

    # 2) Multi-tile test, default tile: B=300 -> tb=152, grid=(2,), ragged last block.
    big_batch = 300
    xb = jax.random.normal(kx, (big_batch, inputdim), dtype=jnp.float32)
    out_b = autoencoder_forward(xb, w1, b1, w2, b2)
    jax.block_until_ready(out_b)
    ref_b = reference_forward(xb, w1, b1, w2, b2)
    assert out_b.shape == (big_batch, inputdim)
    assert jnp.allclose(out_b, ref_b, atol=1e-5, rtol=1e-5)

    # 3) Multi-tile test, explicit small tile: grid=(3,) with a ragged last block.
    out_c = autoencoder_forward(xb, w1, b1, w2, b2, block_batch=128)
    jax.block_until_ready(out_c)
    assert jnp.allclose(out_c, ref_b, atol=1e-5, rtol=1e-5)

    print("KERNEL_OK")
</pallas_src>

<mosaic_0001>
module attributes {stable_mosaic.version = 11 : i64} {
  func.func @ae_kernel(%arg0: i32, %arg1: memref<8x64xf32, #tpu.memory_space<vmem>>, %arg2: memref<64x32xf32, #tpu.memory_space<vmem>>, %arg3: memref<1x32xf32, #tpu.memory_space<vmem>>, %arg4: memref<32x64xf32, #tpu.memory_space<vmem>>, %arg5: memref<1x64xf32, #tpu.memory_space<vmem>>, %arg6: memref<8x64xf32, #tpu.memory_space<vmem>>) attributes {dimension_semantics = [#tpu.dimension_semantics<parallel>], iteration_bounds = array<i64: 1>, scalar_prefetch = 0 : i64, scratch_operands = 0 : i64, tpu.core_type = #tpu.core_type<tc>, window_params = [{transform_indices = @transform_0, window_bounds = array<i64: 8, 64>}, {pipeline_mode = #tpu.pipeline_mode<synchronous>, transform_indices = @transform_1, window_bounds = array<i64: 64, 32>}, {pipeline_mode = #tpu.pipeline_mode<synchronous>, transform_indices = @transform_2, window_bounds = array<i64: 1, 32>}, {pipeline_mode = #tpu.pipeline_mode<synchronous>, transform_indices = @transform_3, window_bounds = array<i64: 32, 64>}, {pipeline_mode = #tpu.pipeline_mode<synchronous>, transform_indices = @transform_4, window_bounds = array<i64: 1, 64>}, {transform_indices = @transform_5, window_bounds = array<i64: 8, 64>}]} {
    %c0 = arith.constant 0 : index
    %c0_0 = arith.constant 0 : index
    %0 = vector.load %arg1[%c0, %c0_0] : memref<8x64xf32, #tpu.memory_space<vmem>>, vector<8x64xf32>
    %c0_1 = arith.constant 0 : index
    %c0_2 = arith.constant 0 : index
    %1 = vector.load %arg2[%c0_1, %c0_2] : memref<64x32xf32, #tpu.memory_space<vmem>>, vector<64x32xf32>
    %cst = arith.constant dense<0.000000e+00> : vector<8x32xf32>
    %2 = tpu.matmul %0, %1, %cst {dimension_numbers = #tpu.dot_dimension_numbers<[1], [0], [0], [1], [0, 0, 1, 1], [], []>} : vector<8x64xf32>, vector<64x32xf32>, vector<8x32xf32> -> vector<8x32xf32>
    %c0_3 = arith.constant 0 : index
    %c0_4 = arith.constant 0 : index
    %3 = vector.load %arg3[%c0_3, %c0_4] : memref<1x32xf32, #tpu.memory_space<vmem>>, vector<1x32xf32>
    %4 = vector.broadcast %3 : vector<1x32xf32> to vector<8x32xf32>
    %5 = arith.addf %2, %4 : vector<8x32xf32>
    %cst_5 = arith.constant 0.000000e+00 : f32
    %6 = vector.broadcast %cst_5 : f32 to vector<8x32xf32>
    %7 = arith.maximumf %5, %6 : vector<8x32xf32>
    %c0_6 = arith.constant 0 : index
    %c0_7 = arith.constant 0 : index
    %8 = vector.load %arg4[%c0_6, %c0_7] : memref<32x64xf32, #tpu.memory_space<vmem>>, vector<32x64xf32>
    %cst_8 = arith.constant dense<0.000000e+00> : vector<8x64xf32>
    %9 = tpu.matmul %7, %8, %cst_8 {dimension_numbers = #tpu.dot_dimension_numbers<[1], [0], [0], [1], [0, 0, 1, 1], [], []>} : vector<8x32xf32>, vector<32x64xf32>, vector<8x64xf32> -> vector<8x64xf32>
    %c0_9 = arith.constant 0 : index
    %c0_10 = arith.constant 0 : index
    %10 = vector.load %arg5[%c0_9, %c0_10] : memref<1x64xf32, #tpu.memory_space<vmem>>, vector<1x64xf32>
    %11 = vector.broadcast %10 : vector<1x64xf32> to vector<8x64xf32>
    %12 = arith.addf %9, %11 : vector<8x64xf32>
    %c0_11 = arith.constant 0 : index
    %c0_12 = arith.constant 0 : index
    %13 = vector.load %arg6[%c0_11, %c0_12] : memref<8x64xf32, #tpu.memory_space<vmem>>, vector<8x64xf32>
    tpu.vector_store %arg6[%c0_11, %c0_12], %12 {strides = array<i32>} : memref<8x64xf32, #tpu.memory_space<vmem>>, vector<8x64xf32>,
    return
  }
  func.func @transform_0(%arg0: i32) -> (i32, i32) {
    %c0_i32 = arith.constant 0 : i32
    %c0_i32_0 = arith.constant 0 : i32
    return %arg0, %c0_i32 : i32, i32
  }
  func.func @transform_1(%arg0: i32) -> (i32, i32) {
    %c0_i32 = arith.constant 0 : i32
    %c0_i32_0 = arith.constant 0 : i32
    %c0_i32_1 = arith.constant 0 : i32
    return %c0_i32, %c0_i32_0 : i32, i32
  }
  func.func @transform_2(%arg0: i32) -> (i32, i32) {
    %c0_i32 = arith.constant 0 : i32
    %c0_i32_0 = arith.constant 0 : i32
    %c0_i32_1 = arith.constant 0 : i32
    return %c0_i32, %c0_i32_0 : i32, i32
  }
  func.func @transform_3(%arg0: i32) -> (i32, i32) {
    %c0_i32 = arith.constant 0 : i32
    %c0_i32_0 = arith.constant 0 : i32
    %c0_i32_1 = arith.constant 0 : i32
    return %c0_i32, %c0_i32_0 : i32, i32
  }
  func.func @transform_4(%arg0: i32) -> (i32, i32) {
    %c0_i32 = arith.constant 0 : i32
    %c0_i32_0 = arith.constant 0 : i32
    %c0_i32_1 = arith.constant 0 : i32
    return %c0_i32, %c0_i32_0 : i32, i32
  }
  func.func @transform_5(%arg0: i32) -> (i32, i32) {
    %c0_i32 = arith.constant 0 : i32
    %c0_i32_0 = arith.constant 0 : i32
    return %arg0, %c0_i32 : i32, i32
  }
}

</mosaic_0001>

<bundles_post_ra>
// kernel: autoencoder_forward.1
= control target key start
LH: loop header
LB: loop body
LE: loop exit
PB: predicated region body
PF: predicated region fallthrough
CT: control target
= control target key end

     0   :  { %s220_s0 = inlined_call_operand.vmem [shape: f32[8,64], index: 0, kind: input, shape index: {}]   ;;  %s221_s1 = inlined_call_operand.vmem [shape: f32[64,32], index: 1, kind: input, shape index: {}]   ;;  %s222_s2 = inlined_call_operand.vmem [shape: f32[1,32], index: 2, kind: input, shape index: {}]   ;;  %s223_s3 = inlined_call_operand.vmem [shape: f32[32,64], index: 3, kind: input, shape index: {}]   ;;  %s224_s4 = inlined_call_operand.vmem [shape: f32[1,64], index: 4, kind: input, shape index: {}]   ;;  %s225_s5 = inlined_call_operand.hbm [shape: f32[8,64], index: 5, kind: output, shape index: {}]  }
   0x1   :  { %v29_v0 = vld [vmem:[%s221_s1 + $0x38] sm:$0xff]  ;;  %v28_v1 = vld [vmem:[%s221_s1 + $0x30] sm:$0xff]  ;;  %v27_v2 = vld [vmem:[%s221_s1 + $0x28] sm:$0xff] }
   0x2   :  { %46 = vmatpush.msra.mxu0 %v29_v0  ;;  %v62_v3 = vld [vmem:[%s223_s3 + $0x18] sm:$0xff]  ;;  %v26_v4 = vld [vmem:[%s221_s1 + $0x20] sm:$0xff] }
   0x3   :  { %83 = vmatpush.msra.mxu1 %v62_v3 }
   0x4   :  { %47 = vmatpush.msra.mxu0 %v28_v1 }
   0x5   :  { %10 = vsyncpa [#allocation3], 0  ;;  %v25_v5 = vld [vmem:[%s221_s1 + $0x18] sm:$0xff]  ;;  %v24_v6 = vld [vmem:[%s221_s1 + $0x10] sm:$0xff]  ;;  %vm34_vm0 = vcmask 523264   ;;  %vm67_vm1 = vcmask 261120  }
   0x6   :  { %48 = vmatpush.msra.mxu0 %v27_v2  ;;  %v23_v7 = vld [vmem:[%s221_s1 + $0x8] sm:$0xff]  ;;  %v22_v8 = vld [vmem:[%s221_s1] sm:$0xff]  ;;  %v61_v10 = vld [vmem:[%s223_s3 + $0x10] sm:$0xff]  ;;  %s139_s21 = smov [#allocation2]  }
   0x7   :  { %v21_v9 = vld [vmem:[%s220_s0] sm:$0xff]  ;;  %84 = vmatpush.msra.mxu1 %v61_v10  ;;  %v60_v11 = vld [vmem:[%s223_s3 + $0x8] sm:$0xff]  ;;  %s97_s22 = sshll.u32 %s139_s21, 4  ;;  %s98_s22 = int_to_ptr.vmem [resolvable:$true] %s97_s22 }
   0x8   :  { %49 = vmatpush.msra.mxu0 %v26_v4  ;;  %v59_v12 = vld [vmem:[%s223_s3] sm:$0xff]  ;;  %s99_s3 = sshll.u32 %s225_s5, 4  ;;  %s100_s3 = int_to_ptr.hbm [resolvable:$true] %s99_s3 }
   0x9   :  { %85 = vmatpush.msra.mxu1 %v60_v11  ;;  %v111_v13 = vld [vmem:[%s222_s2] ss:$0 sm:$0xff] }
   0xa   :  { %50 = vmatpush.msra.mxu0 %v25_v5  ;;  %v112_v17 = vld [vmem:[%s224_s4] ss:$0 sm:$0xff] }
   0xb   :  { %86 = vmatpush.msra.mxu1 %v59_v12 }
   0xc   :  { %51 = vmatpush.msra.mxu0 %v24_v6 }
   0xe   :  { %52 = vmatpush.msra.mxu0 %v23_v7 }
  0x10   :  { %53 = vmatpush.msra.mxu0 %v22_v8 }
  0x11   :  { %108 = vmatmul.msk.f32.vlgmr.msra.gmra.mxu0 %vm34_vm0, %v21_v9 }
  0x8e   :  { %v55_v14 = vpop.f32.mrf.mxu0 }
  0x8f   :  { %v56_v15 = vadd.f32 %v111_v13, %v55_v14 }
  0x91   :  { %v58_v16 = vmax.f32 %v56_v15, 0.0 }
  0x93   :  { %109 = vmatmul.msk.f32.vlgmr.msra.gmra.mxu1 %vm67_vm1, %v58_v16 }
 0x110   :  { %v88_v18 = vpop.f32.mrf.mxu1 }
 0x111   :  { %v89_v19 = vadd.f32 %v112_v17, %v88_v18 }
 0x113   :  { %91 = vst.msk [vmem:[#allocation2] sm:$0xff] %vm34_vm0, %v89_v19 }
 0x114   :  { %102 = dma.vmem_to_hbm [thread:$0]  %s98_s22, 128, %s100_s3, [#allocation3]  }
 0x115   :  { %137 = dma.done.wait [#allocation3], 128  }
 0x116   :  { %138 = vsyncadd [#allocation3], 4294967168 }
 0x117   :  { %107 = vsyncpa [#allocation3], 1 }

</bundles_post_ra>
